<compile_context>
chip_gen: v5e
topology: v5e:2x2
jax: 0.10.0
libtpu: 0.0.40
codegen_flags: <defaults>
</compile_context>

<pallas_src>
import functools

import jax
import jax.numpy as jnp
from jax.experimental import pallas as pl
from jax.experimental.pallas import tpu as pltpu


# ---------------------------------------------------------------------------
# Model hyper-parameters (small, consistent with the module's __init__).
# ---------------------------------------------------------------------------
BATCH = 8
FEATURE_DIM = 32
ENCODER_DIM1 = 64
ENCODER_DIM2 = 16
DECODER_DIM1 = 64
HIDDEN_NUM = 2

BF16 = jnp.bfloat16


def _round_up(a, m):
    return ((a + m - 1) // m) * m


def _ae_kernel(hidden_num, col_z, col_xbar, pad_cols,
               x_ref,
               w_enc_in_ref, b_enc_in_ref,
               w_henc_ref, b_henc_ref,
               w_z_ref, b_z_ref,
               w_dec_ref, b_dec_ref,          # merged z_layer @ dec_in
               w_hdec_ref, b_hdec_ref,
               w_xbar_ref, b_xbar_ref,
               out_ref):
    """Whole AE forward fused; pieces stored into the slab as produced.

    Output slab columns (bf16): [ enc0 | enc1 | ... | encH | z | x_bar | pad ].
    """
    odt = out_ref.dtype
    x = x_ref[...].astype(BF16)
    rows = x.shape[0]

    # Encoder input layer + ReLU (bf16 matmul, f32 accumulate/epilogue).
    h = jnp.dot(x, w_enc_in_ref[...], preferred_element_type=jnp.float32)
    h = jnp.maximum(h + b_enc_in_ref[...], 0.0)
    d1 = h.shape[1]
    out_ref[:, 0:d1] = h.astype(odt)                      # enc0 stored early

    # Hidden encoder layers (static unroll; hidden_num is a Python int).
    for i in range(hidden_num):
        h = jnp.dot(h.astype(BF16), w_henc_ref[i],
                    preferred_element_type=jnp.float32)
        h = jnp.maximum(h + b_henc_ref[i], 0.0)
        off = (i + 1) * d1
        out_ref[:, off:off + d1] = h.astype(odt)          # enc_{i+1} stored early

    hb = h.astype(BF16)

    # z layer (dropout is identity in eval mode); z only feeds the output.
    z = jnp.dot(hb, w_z_ref[...], preferred_element_type=jnp.float32) \
        + b_z_ref[...]
    out_ref[:, col_z:col_z + z.shape[1]] = z.astype(odt)

    # Decoder input from the fused (z_layer @ dec_in) weight — no dependency
    # on z's epilogue; no ReLU between these layers in the reference code.
    d = jnp.dot(hb, w_dec_ref[...], preferred_element_type=jnp.float32) \
        + b_dec_ref[...]

    # Hidden decoder layers + ReLU.
    for i in range(hidden_num):
        d = jnp.dot(d.astype(BF16), w_hdec_ref[i],
                    preferred_element_type=jnp.float32)
        d = jnp.maximum(d + b_hdec_ref[i], 0.0)

    # Reconstruction layer (no activation).
    x_bar = jnp.dot(d.astype(BF16), w_xbar_ref[...],
                    preferred_element_type=jnp.float32) + b_xbar_ref[...]
    out_ref[:, col_xbar:col_xbar + x_bar.shape[1]] = x_bar.astype(odt)

    # Zero the (tiny) unused pad columns so the full slab is deterministic.
    if pad_cols > 0:
        out_ref[:, col_xbar + x_bar.shape[1]:] = jnp.zeros((rows, pad_cols), odt)


def ae_forward(x, params, hidden_num=HIDDEN_NUM, tile_b=None,
               out_dtype=jnp.bfloat16):
    """Fused Pallas AE forward.

    Returns (x_bar, enc_stack, z) where enc_stack has shape
    (batch, hidden_num + 1, encoderdim1) and enc_stack[:, k, :] corresponds to
    the PyTorch `enc_result[k]`. Outputs are `out_dtype` (bf16 by default to
    halve the HBM writeback; values already went through bf16 matmuls).
    """
    n, f = x.shape
    d1 = params["w_enc_in"].shape[1]
    d2 = params["w_z"].shape[1]
    dd1 = params["w_dec_in"].shape[1]

    # ---- Offline fusion: z_layer -> dec_in has no nonlinearity between them
    # in eval mode, so fold them into one (d1, dd1) decoder-input weight.
    w_dec = (params["w_z"].astype(jnp.float32)
             @ params["w_dec_in"].astype(jnp.float32)).astype(BF16)
    b_dec = (params["b_z"].astype(jnp.float32)
             @ params["w_dec_in"].astype(jnp.float32)) + params["b_dec_in"]

    # ---- Output slab layout (lane-dense): [enc0..encH | z | x_bar | pad].
    col_z = (hidden_num + 1) * d1
    col_xbar = col_z + d2
    used_w = col_xbar + f
    slab_w = max(128, _round_up(used_w, 128))
    pad_cols = slab_w - used_w

    # ---- Batch tiling: big tiles amortize per-step overhead; moderate batches
    # split into >= 2 steps so both v7x TensorCores get work; batches that
    # don't divide the tile are zero-padded (fixed pipelined tile everywhere).
    if tile_b is None:
        if n >= 2048:
            tile_b = 1024
        elif n > 256:
            tile_b = _round_up(pl.cdiv(n, 2), 8)
        else:
            tile_b = _round_up(max(n, 8), 8)
    tile_b = max(8, _round_up(tile_b, 8))
    n_pad = _round_up(n, tile_b)
    if n_pad != n:
        x = jnp.pad(x, ((0, n_pad - n), (0, 0)))
    grid = (n_pad // tile_b,)

    batch_map = lambda i: (i, 0)
    const2 = lambda i: (0, 0)
    const3 = lambda i: (0, 0, 0)

    in_specs = [
        pl.BlockSpec((tile_b, f), batch_map),                       # x
        pl.BlockSpec(params["w_enc_in"].shape, const2),             # w_enc_in
        pl.BlockSpec(params["b_enc_in"].shape, const2),             # b_enc_in
        pl.BlockSpec(params["w_henc"].shape, const3),               # w_henc stack
        pl.BlockSpec(params["b_henc"].shape, const3),               # b_henc stack
        pl.BlockSpec(params["w_z"].shape, const2),                  # w_z
        pl.BlockSpec(params["b_z"].shape, const2),                  # b_z
        pl.BlockSpec(w_dec.shape, const2),                          # fused dec-in w
        pl.BlockSpec(b_dec.shape, const2),                          # fused dec-in b
        pl.BlockSpec(params["w_hdec"].shape, const3),               # w_hdec stack
        pl.BlockSpec(params["b_hdec"].shape, const3),               # b_hdec stack
        pl.BlockSpec(params["w_xbar"].shape, const2),               # w_xbar
        pl.BlockSpec(params["b_xbar"].shape, const2),               # b_xbar
    ]
    out_spec = pl.BlockSpec((tile_b, slab_w), batch_map)
    out_shape = jax.ShapeDtypeStruct((n_pad, slab_w), out_dtype)

    # Advisory cost estimate for XLA's scheduler.
    flops = 2 * n_pad * (f * d1
                         + hidden_num * d1 * d1
                         + d1 * d2
                         + d1 * dd1
                         + hidden_num * dd1 * dd1
                         + dd1 * f)
    param_bytes = sum(int(p.size) * p.dtype.itemsize for p in params.values())
    bytes_accessed = (int(x.size) * x.dtype.itemsize + param_bytes
                      + n_pad * slab_w * jnp.dtype(out_dtype).itemsize)
    cost = pl.CostEstimate(flops=int(flops), transcendentals=0,
                           bytes_accessed=int(bytes_accessed))

    kernel = functools.partial(_ae_kernel, hidden_num, col_z, col_xbar, pad_cols)

    slab = pl.pallas_call(
        kernel,
        out_shape=out_shape,
        grid=grid,
        in_specs=in_specs,
        out_specs=out_spec,
        compiler_params=pltpu.CompilerParams(
            dimension_semantics=("parallel",)),
        cost_estimate=cost,
    )(
        x,
        params["w_enc_in"], params["b_enc_in"],
        params["w_henc"], params["b_henc"],
        params["w_z"], params["b_z"],
        w_dec, b_dec,
        params["w_hdec"], params["b_hdec"],
        params["w_xbar"], params["b_xbar"],
    )

    # Split the slab (pad rows from batch padding are dropped here).
    enc_stack = slab[:n, :col_z].reshape(n, hidden_num + 1, d1)
    z = slab[:n, col_z:col_xbar]
    x_bar = slab[:n, col_xbar:col_xbar + f]
    return x_bar, enc_stack, z


def init_params(key, feature_dim, d1, d2, dd1, hidden_num):
    """Synthetic parameter init (Linear weights as (in, out)); weights bf16."""
    ks = jax.random.split(key, 4 + 2 * hidden_num)

    def lin(k, fan_in, fan_out):
        bound = 1.0 / jnp.sqrt(fan_in)
        kw, kb = jax.random.split(k)
        w = jax.random.uniform(kw, (fan_in, fan_out), jnp.float32, -bound, bound)
        b = jax.random.uniform(kb, (1, fan_out), jnp.float32, -bound, bound)
        # Weights live in HBM as bf16 (halves the param DMA); biases stay f32.
        return w.astype(BF16), b

    w_enc_in, b_enc_in = lin(ks[0], feature_dim, d1)
    w_z, b_z = lin(ks[1], d1, d2)
    w_dec_in, b_dec_in = lin(ks[2], d2, dd1)
    w_xbar, b_xbar = lin(ks[3], dd1, feature_dim)

    henc_w, henc_b, hdec_w, hdec_b = [], [], [], []
    for i in range(hidden_num):
        w, b = lin(ks[4 + i], d1, d1)
        henc_w.append(w); henc_b.append(b)
        w, b = lin(ks[4 + hidden_num + i], dd1, dd1)
        hdec_w.append(w); hdec_b.append(b)

    return {
        "w_enc_in": w_enc_in, "b_enc_in": b_enc_in,
        "w_henc": jnp.stack(henc_w), "b_henc": jnp.stack(henc_b),
        "w_z": w_z, "b_z": b_z,
        "w_dec_in": w_dec_in, "b_dec_in": b_dec_in,
        "w_hdec": jnp.stack(hdec_w), "b_hdec": jnp.stack(hdec_b),
        "w_xbar": w_xbar, "b_xbar": b_xbar,
    }


def ae_forward_ref(x, params, hidden_num=HIDDEN_NUM):
    """Pure-JAX reference (unfused, module semantics) with bf16 matmuls."""
    def mm(a, w):
        return jnp.dot(a.astype(BF16), w.astype(BF16),
                       preferred_element_type=jnp.float32)

    h = jax.nn.relu(mm(x, params["w_enc_in"]) + params["b_enc_in"])
    enc = [h]
    for i in range(hidden_num):
        h = jax.nn.relu(mm(h, params["w_henc"][i]) + params["b_henc"][i])
        enc.append(h)
    z = mm(h, params["w_z"]) + params["b_z"]
    d = mm(z, params["w_dec_in"]) + params["b_dec_in"]
    for i in range(hidden_num):
        d = jax.nn.relu(mm(d, params["w_hdec"][i]) + params["b_hdec"][i])
    x_bar = mm(d, params["w_xbar"]) + params["b_xbar"]
    return x_bar, enc, z


def _check(x, params, label):
    x_bar, enc_stack, z = ae_forward(x, params)
    jax.block_until_ready(x_bar)
    jax.block_until_ready(enc_stack)
    jax.block_until_ready(z)

    x_bar_r, enc_r, z_r = ae_forward_ref(x, params)
    # enc / z: identical compute path, only bf16-output rounding on top.
    assert jnp.allclose(z.astype(jnp.float32), z_r, atol=2e-3, rtol=1e-2), label
    for k in range(HIDDEN_NUM + 1):
        assert jnp.allclose(enc_stack[:, k, :].astype(jnp.float32), enc_r[k],
                            atol=2e-3, rtol=1e-2), label
    # x_bar: merged (z_layer @ dec_in) bf16 weight + bf16 output -> slightly
    # looser tolerance than the unfused reference.
    assert jnp.allclose(x_bar.astype(jnp.float32), x_bar_r,
                        atol=2e-2, rtol=3e-2), label


if __name__ == "__main__":
    key = jax.random.PRNGKey(0)
    kx, kx2, kp = jax.random.split(key, 3)
    params = init_params(kp, FEATURE_DIM, ENCODER_DIM1, ENCODER_DIM2,
                         DECODER_DIM1, HIDDEN_NUM)

    # Small batch: single-tile path.
    x_small = jax.random.normal(kx, (BATCH, FEATURE_DIM), jnp.float32)
    _check(x_small, params, "small-batch")

    # Larger batch not divisible by the tile: exercises wrapper-side padding
    # and the >=2-grid-step (v7x dual-TensorCore) path.
    x_big = jax.random.normal(kx2, (600, FEATURE_DIM), jnp.float32)
    _check(x_big, params, "big-batch")

    print("KERNEL_OK")
</pallas_src>

<mosaic_0001>
module attributes {stable_mosaic.version = 11 : i64} {
  func.func @_ae_kernel(%arg0: i32, %arg1: memref<8x32xf32, #tpu.memory_space<vmem>>, %arg2: memref<32x64xbf16, #tpu.memory_space<vmem>>, %arg3: memref<1x64xf32, #tpu.memory_space<vmem>>, %arg4: memref<2x64x64xbf16, #tpu.memory_space<vmem>>, %arg5: memref<2x1x64xf32, #tpu.memory_space<vmem>>, %arg6: memref<64x16xbf16, #tpu.memory_space<vmem>>, %arg7: memref<1x16xf32, #tpu.memory_space<vmem>>, %arg8: memref<64x64xbf16, #tpu.memory_space<vmem>>, %arg9: memref<1x64xf32, #tpu.memory_space<vmem>>, %arg10: memref<2x64x64xbf16, #tpu.memory_space<vmem>>, %arg11: memref<2x1x64xf32, #tpu.memory_space<vmem>>, %arg12: memref<64x32xbf16, #tpu.memory_space<vmem>>, %arg13: memref<1x32xf32, #tpu.memory_space<vmem>>, %arg14: memref<8x256xbf16, #tpu.memory_space<vmem>>) attributes {dimension_semantics = [#tpu.dimension_semantics<parallel>], iteration_bounds = array<i64: 1>, scalar_prefetch = 0 : i64, scratch_operands = 0 : i64, tpu.core_type = #tpu.core_type<tc>, window_params = [{transform_indices = @transform_0, window_bounds = array<i64: 8, 32>}, {pipeline_mode = #tpu.pipeline_mode<synchronous>, transform_indices = @transform_1, window_bounds = array<i64: 32, 64>}, {pipeline_mode = #tpu.pipeline_mode<synchronous>, transform_indices = @transform_2, window_bounds = array<i64: 1, 64>}, {pipeline_mode = #tpu.pipeline_mode<synchronous>, transform_indices = @transform_3, window_bounds = array<i64: 2, 64, 64>}, {pipeline_mode = #tpu.pipeline_mode<synchronous>, transform_indices = @transform_4, window_bounds = array<i64: 2, 1, 64>}, {pipeline_mode = #tpu.pipeline_mode<synchronous>, transform_indices = @transform_5, window_bounds = array<i64: 64, 16>}, {pipeline_mode = #tpu.pipeline_mode<synchronous>, transform_indices = @transform_6, window_bounds = array<i64: 1, 16>}, {pipeline_mode = #tpu.pipeline_mode<synchronous>, transform_indices = @transform_7, window_bounds = array<i64: 64, 64>}, {pipeline_mode = #tpu.pipeline_mode<synchronous>, transform_indices = @transform_8, window_bounds = array<i64: 1, 64>}, {pipeline_mode = #tpu.pipeline_mode<synchronous>, transform_indices = @transform_9, window_bounds = array<i64: 2, 64, 64>}, {pipeline_mode = #tpu.pipeline_mode<synchronous>, transform_indices = @transform_10, window_bounds = array<i64: 2, 1, 64>}, {pipeline_mode = #tpu.pipeline_mode<synchronous>, transform_indices = @transform_11, window_bounds = array<i64: 64, 32>}, {pipeline_mode = #tpu.pipeline_mode<synchronous>, transform_indices = @transform_12, window_bounds = array<i64: 1, 32>}, {transform_indices = @transform_13, window_bounds = array<i64: 8, 256>}]} {
    %c0 = arith.constant 0 : index
    %c0_0 = arith.constant 0 : index
    %0 = vector.load %arg1[%c0, %c0_0] : memref<8x32xf32, #tpu.memory_space<vmem>>, vector<8x32xf32>
    %1 = arith.truncf %0 : vector<8x32xf32> to vector<8x32xbf16>
    %c0_1 = arith.constant 0 : index
    %c0_2 = arith.constant 0 : index
    %2 = vector.load %arg2[%c0_1, %c0_2] : memref<32x64xbf16, #tpu.memory_space<vmem>>, vector<32x64xbf16>
    %cst = arith.constant dense<0.000000e+00> : vector<8x64xf32>
    %3 = tpu.matmul %1, %2, %cst {dimension_numbers = #tpu.dot_dimension_numbers<[1], [0], [0], [1], [0, 0, 1, 1], [], []>} : vector<8x32xbf16>, vector<32x64xbf16>, vector<8x64xf32> -> vector<8x64xf32>
    %c0_3 = arith.constant 0 : index
    %c0_4 = arith.constant 0 : index
    %4 = vector.load %arg3[%c0_3, %c0_4] : memref<1x64xf32, #tpu.memory_space<vmem>>, vector<1x64xf32>
    %5 = vector.broadcast %4 : vector<1x64xf32> to vector<8x64xf32>
    %6 = arith.addf %3, %5 : vector<8x64xf32>
    %cst_5 = arith.constant 0.000000e+00 : f32
    %7 = vector.broadcast %cst_5 : f32 to vector<8x64xf32>
    %8 = arith.maximumf %6, %7 : vector<8x64xf32>
    %9 = arith.truncf %8 : vector<8x64xf32> to vector<8x64xbf16>
    %c0_6 = arith.constant 0 : index
    %c0_7 = arith.constant 0 : index
    %10 = vector.load %arg14[%c0_6, %c0_7] : memref<8x256xbf16, #tpu.memory_space<vmem>>, vector<8x64xbf16>
    tpu.vector_store %arg14[%c0_6, %c0_7], %9 {strides = array<i32>} : memref<8x256xbf16, #tpu.memory_space<vmem>>, vector<8x64xbf16>,
    %11 = arith.truncf %8 : vector<8x64xf32> to vector<8x64xbf16>
    %c0_8 = arith.constant 0 : index
    %c0_9 = arith.constant 0 : index
    %c0_10 = arith.constant 0 : index
    %12 = vector.load %arg4[%c0_8, %c0_9, %c0_10] : memref<2x64x64xbf16, #tpu.memory_space<vmem>>, vector<1x64x64xbf16>
    %13 = vector.shape_cast %12 : vector<1x64x64xbf16> to vector<64x64xbf16>
    %cst_11 = arith.constant dense<0.000000e+00> : vector<8x64xf32>
    %14 = tpu.matmul %11, %13, %cst_11 {dimension_numbers = #tpu.dot_dimension_numbers<[1], [0], [0], [1], [0, 0, 1, 1], [], []>} : vector<8x64xbf16>, vector<64x64xbf16>, vector<8x64xf32> -> vector<8x64xf32>
    %c0_12 = arith.constant 0 : index
    %c0_13 = arith.constant 0 : index
    %c0_14 = arith.constant 0 : index
    %15 = vector.load %arg5[%c0_12, %c0_13, %c0_14] : memref<2x1x64xf32, #tpu.memory_space<vmem>>, vector<1x1x64xf32>
    %16 = vector.shape_cast %15 : vector<1x1x64xf32> to vector<1x64xf32>
    %17 = vector.broadcast %16 : vector<1x64xf32> to vector<8x64xf32>
    %18 = arith.addf %14, %17 : vector<8x64xf32>
    %cst_15 = arith.constant 0.000000e+00 : f32
    %19 = vector.broadcast %cst_15 : f32 to vector<8x64xf32>
    %20 = arith.maximumf %18, %19 : vector<8x64xf32>
    %21 = arith.truncf %20 : vector<8x64xf32> to vector<8x64xbf16>
    %c0_16 = arith.constant 0 : index
    %c64 = arith.constant 64 : index
    %22 = vector.load %arg14[%c0_16, %c64] : memref<8x256xbf16, #tpu.memory_space<vmem>>, vector<8x64xbf16>
    tpu.vector_store %arg14[%c0_16, %c64], %21 {strides = array<i32>} : memref<8x256xbf16, #tpu.memory_space<vmem>>, vector<8x64xbf16>,
    %23 = arith.truncf %20 : vector<8x64xf32> to vector<8x64xbf16>
    %c1 = arith.constant 1 : index
    %c0_17 = arith.constant 0 : index
    %c0_18 = arith.constant 0 : index
    %24 = vector.load %arg4[%c1, %c0_17, %c0_18] : memref<2x64x64xbf16, #tpu.memory_space<vmem>>, vector<1x64x64xbf16>
    %25 = vector.shape_cast %24 : vector<1x64x64xbf16> to vector<64x64xbf16>
    %cst_19 = arith.constant dense<0.000000e+00> : vector<8x64xf32>
    %26 = tpu.matmul %23, %25, %cst_19 {dimension_numbers = #tpu.dot_dimension_numbers<[1], [0], [0], [1], [0, 0, 1, 1], [], []>} : vector<8x64xbf16>, vector<64x64xbf16>, vector<8x64xf32> -> vector<8x64xf32>
    %c1_20 = arith.constant 1 : index
    %c0_21 = arith.constant 0 : index
    %c0_22 = arith.constant 0 : index
    %27 = vector.load %arg5[%c1_20, %c0_21, %c0_22] : memref<2x1x64xf32, #tpu.memory_space<vmem>>, vector<1x1x64xf32>
    %28 = vector.shape_cast %27 : vector<1x1x64xf32> to vector<1x64xf32>
    %29 = vector.broadcast %28 : vector<1x64xf32> to vector<8x64xf32>
    %30 = arith.addf %26, %29 : vector<8x64xf32>
    %cst_23 = arith.constant 0.000000e+00 : f32
    %31 = vector.broadcast %cst_23 : f32 to vector<8x64xf32>
    %32 = arith.maximumf %30, %31 : vector<8x64xf32>
    %33 = arith.truncf %32 : vector<8x64xf32> to vector<8x64xbf16>
    %c0_24 = arith.constant 0 : index
    %c128 = arith.constant 128 : index
    %34 = vector.load %arg14[%c0_24, %c128] : memref<8x256xbf16, #tpu.memory_space<vmem>>, vector<8x64xbf16>
    tpu.vector_store %arg14[%c0_24, %c128], %33 {strides = array<i32>} : memref<8x256xbf16, #tpu.memory_space<vmem>>, vector<8x64xbf16>,
    %35 = arith.truncf %32 : vector<8x64xf32> to vector<8x64xbf16>
    %c0_25 = arith.constant 0 : index
    %c0_26 = arith.constant 0 : index
    %36 = vector.load %arg6[%c0_25, %c0_26] : memref<64x16xbf16, #tpu.memory_space<vmem>>, vector<64x16xbf16>
    %cst_27 = arith.constant dense<0.000000e+00> : vector<8x16xf32>
    %37 = tpu.matmul %35, %36, %cst_27 {dimension_numbers = #tpu.dot_dimension_numbers<[1], [0], [0], [1], [0, 0, 1, 1], [], []>} : vector<8x64xbf16>, vector<64x16xbf16>, vector<8x16xf32> -> vector<8x16xf32>
    %c0_28 = arith.constant 0 : index
    %c0_29 = arith.constant 0 : index
    %38 = vector.load %arg7[%c0_28, %c0_29] : memref<1x16xf32, #tpu.memory_space<vmem>>, vector<1x16xf32>
    %39 = vector.broadcast %38 : vector<1x16xf32> to vector<8x16xf32>
    %40 = arith.addf %37, %39 : vector<8x16xf32>
    %41 = arith.truncf %40 : vector<8x16xf32> to vector<8x16xbf16>
    %c0_30 = arith.constant 0 : index
    %c192 = arith.constant 192 : index
    %42 = vector.load %arg14[%c0_30, %c192] : memref<8x256xbf16, #tpu.memory_space<vmem>>, vector<8x16xbf16>
    tpu.vector_store %arg14[%c0_30, %c192], %41 {strides = array<i32>} : memref<8x256xbf16, #tpu.memory_space<vmem>>, vector<8x16xbf16>,
    %c0_31 = arith.constant 0 : index
    %c0_32 = arith.constant 0 : index
    %43 = vector.load %arg8[%c0_31, %c0_32] : memref<64x64xbf16, #tpu.memory_space<vmem>>, vector<64x64xbf16>
    %cst_33 = arith.constant dense<0.000000e+00> : vector<8x64xf32>
    %44 = tpu.matmul %35, %43, %cst_33 {dimension_numbers = #tpu.dot_dimension_numbers<[1], [0], [0], [1], [0, 0, 1, 1], [], []>} : vector<8x64xbf16>, vector<64x64xbf16>, vector<8x64xf32> -> vector<8x64xf32>
    %c0_34 = arith.constant 0 : index
    %c0_35 = arith.constant 0 : index
    %45 = vector.load %arg9[%c0_34, %c0_35] : memref<1x64xf32, #tpu.memory_space<vmem>>, vector<1x64xf32>
    %46 = vector.broadcast %45 : vector<1x64xf32> to vector<8x64xf32>
    %47 = arith.addf %44, %46 : vector<8x64xf32>
    %48 = arith.truncf %47 : vector<8x64xf32> to vector<8x64xbf16>
    %c0_36 = arith.constant 0 : index
    %c0_37 = arith.constant 0 : index
    %c0_38 = arith.constant 0 : index
    %49 = vector.load %arg10[%c0_36, %c0_37, %c0_38] : memref<2x64x64xbf16, #tpu.memory_space<vmem>>, vector<1x64x64xbf16>
    %50 = vector.shape_cast %49 : vector<1x64x64xbf16> to vector<64x64xbf16>
    %cst_39 = arith.constant dense<0.000000e+00> : vector<8x64xf32>
    %51 = tpu.matmul %48, %50, %cst_39 {dimension_numbers = #tpu.dot_dimension_numbers<[1], [0], [0], [1], [0, 0, 1, 1], [], []>} : vector<8x64xbf16>, vector<64x64xbf16>, vector<8x64xf32> -> vector<8x64xf32>
    %c0_40 = arith.constant 0 : index
    %c0_41 = arith.constant 0 : index
    %c0_42 = arith.constant 0 : index
    %52 = vector.load %arg11[%c0_40, %c0_41, %c0_42] : memref<2x1x64xf32, #tpu.memory_space<vmem>>, vector<1x1x64xf32>
    %53 = vector.shape_cast %52 : vector<1x1x64xf32> to vector<1x64xf32>
    %54 = vector.broadcast %53 : vector<1x64xf32> to vector<8x64xf32>
    %55 = arith.addf %51, %54 : vector<8x64xf32>
    %cst_43 = arith.constant 0.000000e+00 : f32
    %56 = vector.broadcast %cst_43 : f32 to vector<8x64xf32>
    %57 = arith.maximumf %55, %56 : vector<8x64xf32>
    %58 = arith.truncf %57 : vector<8x64xf32> to vector<8x64xbf16>
    %c1_44 = arith.constant 1 : index
    %c0_45 = arith.constant 0 : index
    %c0_46 = arith.constant 0 : index
    %59 = vector.load %arg10[%c1_44, %c0_45, %c0_46] : memref<2x64x64xbf16, #tpu.memory_space<vmem>>, vector<1x64x64xbf16>
    %60 = vector.shape_cast %59 : vector<1x64x64xbf16> to vector<64x64xbf16>
    %cst_47 = arith.constant dense<0.000000e+00> : vector<8x64xf32>
    %61 = tpu.matmul %58, %60, %cst_47 {dimension_numbers = #tpu.dot_dimension_numbers<[1], [0], [0], [1], [0, 0, 1, 1], [], []>} : vector<8x64xbf16>, vector<64x64xbf16>, vector<8x64xf32> -> vector<8x64xf32>
    %c1_48 = arith.constant 1 : index
    %c0_49 = arith.constant 0 : index
    %c0_50 = arith.constant 0 : index
    %62 = vector.load %arg11[%c1_48, %c0_49, %c0_50] : memref<2x1x64xf32, #tpu.memory_space<vmem>>, vector<1x1x64xf32>
    %63 = vector.shape_cast %62 : vector<1x1x64xf32> to vector<1x64xf32>
    %64 = vector.broadcast %63 : vector<1x64xf32> to vector<8x64xf32>
    %65 = arith.addf %61, %64 : vector<8x64xf32>
    %cst_51 = arith.constant 0.000000e+00 : f32
    %66 = vector.broadcast %cst_51 : f32 to vector<8x64xf32>
    %67 = arith.maximumf %65, %66 : vector<8x64xf32>
    %68 = arith.truncf %67 : vector<8x64xf32> to vector<8x64xbf16>
    %c0_52 = arith.constant 0 : index
    %c0_53 = arith.constant 0 : index
    %69 = vector.load %arg12[%c0_52, %c0_53] : memref<64x32xbf16, #tpu.memory_space<vmem>>, vector<64x32xbf16>
    %cst_54 = arith.constant dense<0.000000e+00> : vector<8x32xf32>
    %70 = tpu.matmul %68, %69, %cst_54 {dimension_numbers = #tpu.dot_dimension_numbers<[1], [0], [0], [1], [0, 0, 1, 1], [], []>} : vector<8x64xbf16>, vector<64x32xbf16>, vector<8x32xf32> -> vector<8x32xf32>
    %c0_55 = arith.constant 0 : index
    %c0_56 = arith.constant 0 : index
    %71 = vector.load %arg13[%c0_55, %c0_56] : memref<1x32xf32, #tpu.memory_space<vmem>>, vector<1x32xf32>
    %72 = vector.broadcast %71 : vector<1x32xf32> to vector<8x32xf32>
    %73 = arith.addf %70, %72 : vector<8x32xf32>
    %74 = arith.truncf %73 : vector<8x32xf32> to vector<8x32xbf16>
    %c0_57 = arith.constant 0 : index
    %c208 = arith.constant 208 : index
    %75 = vector.load %arg14[%c0_57, %c208] : memref<8x256xbf16, #tpu.memory_space<vmem>>, vector<8x32xbf16>
    tpu.vector_store %arg14[%c0_57, %c208], %74 {strides = array<i32>} : memref<8x256xbf16, #tpu.memory_space<vmem>>, vector<8x32xbf16>,
    %cst_58 = arith.constant 0.000000e+00 : bf16
    %76 = vector.broadcast %cst_58 : bf16 to vector<8x16xbf16>
    %c0_59 = arith.constant 0 : index
    %c240 = arith.constant 240 : index
    %77 = vector.load %arg14[%c0_59, %c240] : memref<8x256xbf16, #tpu.memory_space<vmem>>, vector<8x16xbf16>
    tpu.vector_store %arg14[%c0_59, %c240], %76 {strides = array<i32>} : memref<8x256xbf16, #tpu.memory_space<vmem>>, vector<8x16xbf16>,
    return
  }
  func.func @transform_0(%arg0: i32) -> (i32, i32) {
    %c0_i32 = arith.constant 0 : i32
    %c0_i32_0 = arith.constant 0 : i32
    return %arg0, %c0_i32 : i32, i32
  }
  func.func @transform_1(%arg0: i32) -> (i32, i32) {
    %c0_i32 = arith.constant 0 : i32
    %c0_i32_0 = arith.constant 0 : i32
    %c0_i32_1 = arith.constant 0 : i32
    return %c0_i32, %c0_i32_0 : i32, i32
  }
  func.func @transform_2(%arg0: i32) -> (i32, i32) {
    %c0_i32 = arith.constant 0 : i32
    %c0_i32_0 = arith.constant 0 : i32
    %c0_i32_1 = arith.constant 0 : i32
    return %c0_i32, %c0_i32_0 : i32, i32
  }
  func.func @transform_3(%arg0: i32) -> (i32, i32, i32) {
    %c0_i32 = arith.constant 0 : i32
    %c0_i32_0 = arith.constant 0 : i32
    %c0_i32_1 = arith.constant 0 : i32
    %c0_i32_2 = arith.constant 0 : i32
    return %c0_i32, %c0_i32_0, %c0_i32_1 : i32, i32, i32
  }
  func.func @transform_4(%arg0: i32) -> (i32, i32, i32) {
    %c0_i32 = arith.constant 0 : i32
    %c0_i32_0 = arith.constant 0 : i32
    %c0_i32_1 = arith.constant 0 : i32
    %c0_i32_2 = arith.constant 0 : i32
    return %c0_i32, %c0_i32_0, %c0_i32_1 : i32, i32, i32
  }
  func.func @transform_5(%arg0: i32) -> (i32, i32) {
    %c0_i32 = arith.constant 0 : i32
    %c0_i32_0 = arith.constant 0 : i32
    %c0_i32_1 = arith.constant 0 : i32
    return %c0_i32, %c0_i32_0 : i32, i32
  }
  func.func @transform_6(%arg0: i32) -> (i32, i32) {
    %c0_i32 = arith.constant 0 : i32
    %c0_i32_0 = arith.constant 0 : i32
    %c0_i32_1 = arith.constant 0 : i32
    return %c0_i32, %c0_i32_0 : i32, i32
  }
  func.func @transform_7(%arg0: i32) -> (i32, i32) {
    %c0_i32 = arith.constant 0 : i32
    %c0_i32_0 = arith.constant 0 : i32
    %c0_i32_1 = arith.constant 0 : i32
    return %c0_i32, %c0_i32_0 : i32, i32
  }
  func.func @transform_8(%arg0: i32) -> (i32, i32) {
    %c0_i32 = arith.constant 0 : i32
    %c0_i32_0 = arith.constant 0 : i32
    %c0_i32_1 = arith.constant 0 : i32
    return %c0_i32, %c0_i32_0 : i32, i32
  }
  func.func @transform_9(%arg0: i32) -> (i32, i32, i32) {
    %c0_i32 = arith.constant 0 : i32
    %c0_i32_0 = arith.constant 0 : i32
    %c0_i32_1 = arith.constant 0 : i32
    %c0_i32_2 = arith.constant 0 : i32
    return %c0_i32, %c0_i32_0, %c0_i32_1 : i32, i32, i32
  }
  func.func @transform_10(%arg0: i32) -> (i32, i32, i32) {
    %c0_i32 = arith.constant 0 : i32
    %c0_i32_0 = arith.constant 0 : i32
    %c0_i32_1 = arith.constant 0 : i32
    %c0_i32_2 = arith.constant 0 : i32
    return %c0_i32, %c0_i32_0, %c0_i32_1 : i32, i32, i32
  }
  func.func @transform_11(%arg0: i32) -> (i32, i32) {
    %c0_i32 = arith.constant 0 : i32
    %c0_i32_0 = arith.constant 0 : i32
    %c0_i32_1 = arith.constant 0 : i32
    return %c0_i32, %c0_i32_0 : i32, i32
  }
  func.func @transform_12(%arg0: i32) -> (i32, i32) {
    %c0_i32 = arith.constant 0 : i32
    %c0_i32_0 = arith.constant 0 : i32
    %c0_i32_1 = arith.constant 0 : i32
    return %c0_i32, %c0_i32_0 : i32, i32
  }
  func.func @transform_13(%arg0: i32) -> (i32, i32) {
    %c0_i32 = arith.constant 0 : i32
    %c0_i32_0 = arith.constant 0 : i32
    return %arg0, %c0_i32 : i32, i32
  }
}

</mosaic_0001>

<bundles_post_ra>
// kernel: tpu_custom_call.1
= control target key start
LH: loop header
LB: loop body
LE: loop exit
PB: predicated region body
PF: predicated region fallthrough
CT: control target
= control target key end

     0   :  { %18 = vsyncpa [#allocation3], 0  ;;  %s1226_s0 = inlined_call_operand.hbm [shape: f32[8,32], index: 0, kind: input, shape index: {}]   ;;  %s1227_s1 = inlined_call_operand.vmem [shape: bf16[32,64], index: 1, kind: input, shape index: {}]   ;;  %s1228_s2 = inlined_call_operand.hbm [shape: f32[1,64], index: 2, kind: input, shape index: {}]   ;;  %s1229_s3 = inlined_call_operand.vmem [shape: bf16[2,64,64], index: 3, kind: input, shape index: {}]   ;;  %s1230_s4 = inlined_call_operand.hbm [shape: f32[2,1,64], index: 4, kind: input, shape index: {}]   ;;  %s1231_s5 = inlined_call_operand.vmem [shape: bf16[64,16], index: 5, kind: input, shape index: {}]   ;;  %s1232_s6 = inlined_call_operand.hbm [shape: f32[1,16], index: 6, kind: input, shape index: {}]   ;;  %s1233_s7 = inlined_call_operand.hbm [shape: bf16[64,64], index: 7, kind: input, shape index: {}]   ;;  %s1234_s8 = inlined_call_operand.hbm [shape: f32[1,64], index: 8, kind: input, shape index: {}]   ;;  %s1235_s9 = inlined_call_operand.hbm [shape: bf16[2,64,64], index: 9, kind: input, shape index: {}]   ;;  %s1236_s10 = inlined_call_operand.hbm [shape: f32[2,1,64], index: 10, kind: input, shape index: {}]   ;;  %s1237_s11 = inlined_call_operand.vmem [shape: bf16[64,32], index: 11, kind: input, shape index: {}]   ;;  %s1238_s12 = inlined_call_operand.vmem [shape: f32[1,32], index: 12, kind: input, shape index: {}]   ;;  %s1239_s13 = inlined_call_operand.hbm [shape: bf16[8,256], index: 13, kind: output, shape index: {}]  }
   0x1   :  { %19 = vsyncpa [#allocation6], 0 }
   0x2   :  { %20 = vsyncpa [#allocation9], 0 }
   0x3   :  { %21 = vsyncpa [#allocation12], 0 }
   0x4   :  { %22 = vsyncpa [#allocation15], 0  ;;  %s42_s27 = sshll.u32 %s1228_s2, 4  ;;  %s43_s27 = int_to_ptr.hbm [resolvable:$true] %s42_s27 }
   0x5   :  { %23 = vsyncpa [#allocation4], 0  ;;  %s1042_s28 = smov [#allocation5]   ;;  %s70_s15 = sshll.u32 %s1232_s6, 4  ;;  %s71_s15 = int_to_ptr.hbm [resolvable:$true] %s70_s15 }
   0x6   :  { %s44_s29 = sshll.u32 %s1042_s28, 4  ;;  %s1043_s16 = smov [#allocation8]   ;;  %s45_s29 = int_to_ptr.vmem [resolvable:$true] %s44_s29 }
   0x7   :  { %47 = dma.hbm_to_vmem [thread:$0]  %s43_s27, 16, %s45_s29, [#allocation6]  }
   0x8   :  { %s72_s17 = sshll.u32 %s1043_s16, 4  ;;  %s94_s20 = sshll.u32 %s1234_s8, 4  ;;  %s73_s17 = int_to_ptr.vmem [resolvable:$true] %s72_s17  ;;  %s95_s20 = int_to_ptr.hbm [resolvable:$true] %s94_s20 }
   0x9   :  { %75 = dma.hbm_to_vmem [thread:$0]  %s71_s15, 16, %s73_s17, [#allocation9]  }
   0xa   :  { %s29_s22 = sshll.u32 %s1226_s0, 4  ;;  %s1044_s23 = smov [#allocation11]   ;;  %s30_s22 = int_to_ptr.hbm [resolvable:$true] %s29_s22 }
   0xb   :  { %s96_s24 = sshll.u32 %s1044_s23, 4  ;;  %s1045_s6 = smov [#allocation2]   ;;  %s97_s24 = int_to_ptr.vmem [resolvable:$true] %s96_s24 }
   0xc   :  { %99 = dma.hbm_to_vmem [thread:$0]  %s95_s20, 16, %s97_s24, [#allocation12]  }
   0xd   :  { %s31_s25 = sshll.u32 %s1045_s6, 4  ;;  %s54_s28 = sshll.u32 %s1230_s4, 4  ;;  %s32_s25 = int_to_ptr.vmem [resolvable:$true] %s31_s25  ;;  %s55_s28 = int_to_ptr.hbm [resolvable:$true] %s54_s28 }
   0xe   :  { %34 = dma.hbm_to_vmem [thread:$0]  %s30_s22, 128, %s32_s25, [#allocation3]  }
   0xf   :  { %s1046_s8 = smov [#allocation7]   ;;  %s80_s0 = sshll.u32 %s1233_s7, 4  ;;  %s81_s0 = int_to_ptr.hbm [resolvable:$true] %s80_s0 }
  0x10   :  { %s56_s29 = sshll.u32 %s1046_s8, 4  ;;  %s1047_s15 = smov 16   ;;  %s57_s29 = int_to_ptr.vmem [resolvable:$true] %s56_s29 }
  0x11   :  { %s1048_s16 = smov 1   ;;  %s1049_s17 = smov [#allocation10]  }
  0x12   :  { %62 = dma.hbm_to_vmem [thread:$0]  %s55_s28, 32, %s57_s29, [#allocation6], %s1047_s15, %s1047_s15, %s1048_s16  }
  0x13   :  { %s82_s18 = sshll.u32 %s1049_s17, 4  ;;  %s1050_s19 = smov 64   ;;  %s83_s18 = int_to_ptr.vmem [resolvable:$true] %s82_s18 }
  0x14   :  { %s1051_s20 = smov 4   ;;  %s104_s21 = sshll.u32 %s1235_s9, 4  ;;  %s105_s21 = int_to_ptr.hbm [resolvable:$true] %s104_s21 }
  0x15   :  { %88 = dma.hbm_to_vmem [thread:$0]  %s81_s0, 512, %s83_s18, [#allocation9], %s1050_s19, %s1050_s19, %s1051_s20  }
  0x16   :  { %s1052_s22 = smov [#allocation13]   ;;  %s117_s6 = sshll.u32 %s1236_s10, 4  ;;  %s118_s6 = int_to_ptr.hbm [resolvable:$true] %s117_s6 }
  0x17   :  { %s106_s23 = sshll.u32 %s1052_s22, 4  ;;  %s1053_s25 = smov [#allocation14]   ;;  %s107_s23 = int_to_ptr.vmem [resolvable:$true] %s106_s23 }
  0x18   :  { %112 = dma.hbm_to_vmem [thread:$0]  %s105_s21, 1024, %s107_s23, [#allocation12], %s1050_s19, %s1050_s19, %s1051_s20  }
  0x19   :  { %s119_s26 = sshll.u32 %s1053_s25, 4  ;;  %s120_s26 = int_to_ptr.vmem [resolvable:$true] %s119_s26 }
  0x1a   :  { %125 = dma.hbm_to_vmem [thread:$0]  %s118_s6, 32, %s120_s26, [#allocation15], %s1047_s15, %s1047_s15, %s1048_s16  }
  0x1b   :  { %1030 = dma.done.wait [#allocation3], 128  }
  0x1c   :  { %1031 = vsyncadd [#allocation3], 4294967168 }
  0x1d   :  { %1032 = dma.done.wait [#allocation6], 48  }
  0x1e   :  { %1033 = vsyncadd [#allocation6], 4294967248 }
  0x1f   :  { %1034 = dma.done.wait [#allocation9], 528  }
  0x20   :  { %1035 = vsyncadd [#allocation9], 4294966768 }
  0x21   :  { %1036 = dma.done.wait [#allocation12], 1040  }
  0x22   :  { %1037 = vsyncadd [#allocation12], 4294966256 }
  0x23   :  { %1038 = dma.done.wait [#allocation15], 32  }
  0x24   :  { %1039 = vsyncadd [#allocation15], 4294967264  ;;  %v762_v0 = vld [vmem:[%s1227_s1 + $0x8] sm:$0xff]  ;;  %v761_v1 = vld [vmem:[%s1227_s1] sm:$0xff]  ;;  %vm185_vm0 = vcmask 261120   ;;  %vm204_vm1 = vcmask 519168  }
  0x25   :  { %v163_v2 = vld [vmem:[#allocation2] sm:$0xff]  ;;  %v766_v3 = vld [vmem:[%s1229_s3 + $0x18] sm:$0xff]  ;;  %195 = vmatpush.bf16.msra.mxu0 %v762_v0  ;;  %v765_v4 = vld [vmem:[%s1229_s3 + $0x10] sm:$0xff]  ;;  %vm242_vm2 = vcmask 523264   ;;  %vm265_vm3 = vcmask 1043968   ;;  %vm381_vm4 = vcmask 650752  }
  0x26   :  { %250 = vmatpush.bf16.msra.mxu1 %v766_v3  ;;  %v164_v5 = vpack.c.bf16 %v163_v2, %v163_v2  ;;  %v764_v6 = vld [vmem:[%s1229_s3 + $0x8] sm:$0xff]  ;;  %v763_v7 = vld [vmem:[%s1229_s3] sm:$0xff]  ;;  %v770_v8 = vld [vmem:[%s1229_s3 + $0x38] sm:$0xff]  ;;  %s1054_s1 = smov 80   ;;  %s611_s20 = sshll.u32 %s1239_s13, 4  ;;  %vm600_vm5 = vcmask 913024   ;;  %s612_s20 = int_to_ptr.hbm [resolvable:$true] %s611_s20 }
  0x27   :  { %312 = vmatpush.bf16.msra.mxu2 %v770_v8  ;;  %v769_v9 = vld [vmem:[%s1229_s3 + $0x30] sm:$0xff]  ;;  %v806_v10 = vld [vmem:[#allocation5] ss:$0 sm:$0xff]  ;;  %v767_v17 = vld [vmem:[%s1229_s3 + $0x20] sm:$0xff]  ;;  %vm602_vm6 = vcmask 1044352  }
  0x28   :  { %v768_v16 = vld [vmem:[%s1229_s3 + $0x28] sm:$0xff]  ;;  %v774_v25 = vld [vmem:[%s1231_s5 + $0x18] sm:$0xff]  ;;  %v773_v27 = vld [vmem:[%s1231_s5 + $0x10] sm:$0xff] }
  0x29   :  { %196 = vmatpush.bf16.msra.mxu0 %v761_v1  ;;  %v807_v18 = vld [vmem:[#allocation7] ss:$0 sm:$0xff]  ;;  %367 = vmatpush.bf16.msra.mxu3 %v774_v25  ;;  %v777_v26 = vld [vmem:[#allocation10 + $0x10] sm:$0xff]  ;;  %v776_v28 = vld [vmem:[#allocation10 + $0x8] sm:$0xff] }
  0x2a   :  { %251 = vmatpush.bf16.msra.mxu1 %v765_v4  ;;  %v778_v24 = vld [vmem:[#allocation10 + $0x18] sm:$0xff]  ;;  %v775_v30 = vld [vmem:[#allocation10] sm:$0xff]  ;;  %v780_v34 = vld [vmem:[#allocation13 + $0x8] sm:$0xff] }
  0x2b   :  { %313 = vmatpush.bf16.msra.mxu2 %v769_v9  ;;  %v772_v29 = vld [vmem:[%s1231_s5 + $0x8] sm:$0xff]  ;;  %v771_v31 = vld [vmem:[%s1231_s5] sm:$0xff]  ;;  %v779_v42 = vld [vmem:[#allocation13] sm:$0xff] }
  0x2c   :  { %633 = vmatmul.msk.bf16.vlgmr.msra.gmra.mxu0 %vm185_vm0, %v164_v5  ;;  %v782_v32 = vld [vmem:[#allocation13 + $0x18] sm:$0xff]  ;;  %v781_v33 = vld [vmem:[#allocation13 + $0x10] sm:$0xff]  ;;  %v784_v55 = vld [vmem:[#allocation13 + $0x28] sm:$0xff] }
  0x2d   :  { %423 = vmatpush.bf16.msrb.mxu0 %v778_v24  ;;  %368 = vmatpush.bf16.msra.mxu3 %v773_v27  ;;  %v808_v36 = vld [vmem:[#allocation7 + $0x1] ss:$0 sm:$0xff]  ;;  %v785_v44 = vld [vmem:[#allocation13 + $0x30] sm:$0xff]  ;;  %v809_v45 = vld [vmem:[#allocation11] ss:$0 sm:$0xff] }
  0x2e   :  { %252 = vmatpush.bf16.msra.mxu1 %v764_v6  ;;  %v786_v43 = vld [vmem:[#allocation13 + $0x38] sm:$0xff]  ;;  %v783_v56 = vld [vmem:[#allocation13 + $0x20] sm:$0xff]  ;;  %v790_v57 = vld [vmem:[%s1237_s11 + $0x18] sm:$0xff] }
  0x2f   :  { %314 = vmatpush.bf16.msra.mxu2 %v768_v16  ;;  %v810_v49 = vld [vmem:[#allocation8] ss:$0 sm:$0xff]  ;;  %v789_v58 = vld [vmem:[%s1237_s11 + $0x10] sm:$0xff]  ;;  %v787_v3 = vld [vmem:[%s1237_s11] sm:$0xff]  ;;  %v1056_v16 = vmov 0  }
  0x30   :  { %v788_v59 = vld [vmem:[%s1237_s11 + $0x8] sm:$0xff]  ;;  %v811_v61 = vld [vmem:[#allocation14] ss:$0 sm:$0xff]  ;;  %v812_v4 = vld [vmem:[#allocation14 + $0x1] ss:$0 sm:$0xff]  ;;  %s1055_s11 = smov [#allocation16]  }
  0x31   :  { %424 = vmatpush.bf16.msrb.mxu0 %v777_v26  ;;  %369 = vmatpush.bf16.msra.mxu3 %v772_v29  ;;  %s609_s16 = sshll.u32 %s1055_s11, 4  ;;  %s610_s16 = int_to_ptr.vmem [resolvable:$true] %s609_s16 }
  0x32   :  { %253 = vmatpush.bf16.msra.mxu1 %v763_v7 }
  0x33   :  { %315 = vmatpush.bf16.msra.mxu2 %v767_v17 }
  0x35   :  { %425 = vmatpush.bf16.msrb.mxu0 %v776_v28  ;;  %370 = vmatpush.bf16.msra.mxu3 %v771_v31 }
  0x36   :  { %476 = vmatpush.bf16.msrb.mxu1 %v782_v32 }
  0x37   :  { %532 = vmatpush.bf16.msrb.mxu2 %v786_v43 }
  0x39   :  { %426 = vmatpush.bf16.msrb.mxu0 %v775_v30  ;;  %586 = vmatpush.bf16.msrb.mxu3 %v790_v57 }
  0x3a   :  { %477 = vmatpush.bf16.msrb.mxu1 %v781_v33 }
  0x3b   :  { %533 = vmatpush.bf16.msrb.mxu2 %v785_v44 }
  0x3d   :  { %587 = vmatpush.bf16.msrb.mxu3 %v789_v58 }
  0x3e   :  { %478 = vmatpush.bf16.msrb.mxu1 %v780_v34 }
  0x3f   :  { %534 = vmatpush.bf16.msrb.mxu2 %v784_v55 }
  0x41   :  { %588 = vmatpush.bf16.msrb.mxu3 %v788_v59 }
  0x42   :  { %479 = vmatpush.bf16.msrb.mxu1 %v779_v42 }
  0x43   :  { %535 = vmatpush.bf16.msrb.mxu2 %v783_v56 }
  0x45   :  { %589 = vmatpush.bf16.msrb.mxu3 %v787_v3 }
  0xa9   :  { %v198_v11 = vpop.f32.mrf.mxu0 }
  0xaa   :  { %v199_v12 = vadd.f32 %v806_v10, %v198_v11  ;;  %v813_v10 = vld [vmem:[%s1238_s12] ss:$0 sm:$0xff] }
  0xac   :  { %v202_v13 = vmax.f32 %v199_v12, 0.0 }
  0xae   :  { %v203_v14 = vpack.c.bf16 %v202_v13, %v202_v13 }
  0xb0   :  { %205 = vst.msk [vmem:[#allocation16] sm:$0xf] %vm204_vm1, %v203_v14  ;;  %650 = vmatmul.msk.bf16.vlgmr.msra.gmra.mxu1 %vm242_vm2, %v203_v14 }
  0xb1   :  { %v200_v15 = vpop.f32.mrf.mxu0 }
 0x12d   :  { %v255_v19 = vpop.f32.mrf.mxu1 }
 0x12e   :  { %v256_v20 = vadd.f32 %v807_v18, %v255_v19 }
 0x130   :  { %v259_v21 = vmax.f32 %v256_v20, 0.0 }
 0x132   :  { %v260_v22 = vpack.c.bf16 %v259_v21, %v259_v21 }
 0x134   :  { %262 = vrot.lane.b32.xlu1 %v260_v22, %s1050_s19  ;;  %675 = vmatmul.msk.bf16.vlgmr.msra.gmra.mxu2 %vm242_vm2, %v260_v22 }
 0x135   :  { %v257_v23 = vpop.f32.mrf.mxu1 }
 0x1a6   :  { %v263_v35 = vpop.permute.xlu1 %262 }
 0x1a7   :  { %266 = vst.msk [vmem:[#allocation16] sm:$0xf] %vm265_vm3, %v263_v35 }
 0x1b7   :  { %v317_v37 = vpop.f32.mrf.mxu2 }
 0x1b8   :  { %v318_v38 = vadd.f32 %v808_v36, %v317_v37 }
 0x1ba   :  { %v321_v39 = vmax.f32 %v318_v38, 0.0 }
 0x1bc   :  { %v322_v40 = vpack.c.bf16 %v321_v39, %v321_v39 }
 0x1be   :  { %323 = vst.msk [vmem:[#allocation16 + $0x4] sm:$0xf] %vm204_vm1, %v322_v40  ;;  %692 = vmatmul.msk.bf16.vlgmr.msra.gmra.mxu3 %vm242_vm2, %v322_v40  ;;  %709 = vmatmul.msk.bf16.vlgmr.msrb.gmra.mxu0 %vm242_vm2, %v322_v40 }
 0x1bf   :  { %v319_v41 = vpop.f32.mrf.mxu2 }
 0x23b   :  { %v428_v46 = vpop.f32.mrf.mxu0 }
 0x23c   :  { %v429_v47 = vadd.f32 %v809_v45, %v428_v46 }
 0x23e   :  { %v432_v48 = vpack.c.bf16 %v429_v47, %v429_v47 }
 0x240   :  { %726 = vmatmul.msk.bf16.vlgmr.msrb.gmra.mxu1 %vm242_vm2, %v432_v48 }
 0x241   :  { %v372_v50 = vpop.f32.mrf.mxu3 }
 0x242   :  { %v373_v51 = vadd.f32 %v810_v49, %v372_v50 }
 0x243   :  { %v430_v52 = vpop.f32.mrf.mxu0 }
 0x244   :  { %v376_v53 = vpack.c.bf16 %v373_v51, %v373_v51 }
 0x246   :  { %378 = vrot.lane.b32.xlu0 %v376_v53, %s1050_s19 }
 0x249   :  { %v374_v54 = vpop.f32.mrf.mxu3 }
 0x2b8   :  { %v379_v60 = vpop.permute.xlu0 %378 }
 0x2b9   :  { %382 = vst.msk [vmem:[#allocation16 + $0x4] sm:$0xf] %vm381_vm4, %v379_v60 }
 0x2bd   :  { %v481_v62 = vpop.f32.mrf.mxu1 }
 0x2be   :  { %v482_v63 = vadd.f32 %v811_v61, %v481_v62 }
 0x2c0   :  { %v485_v0 = vmax.f32 %v482_v63, 0.0 }
 0x2c2   :  { %v486_v1 = vpack.c.bf16 %v485_v0, %v485_v0 }
 0x2c4   :  { %743 = vmatmul.msk.bf16.vlgmr.msrb.gmra.mxu2 %vm242_vm2, %v486_v1 }
 0x2c5   :  { %v483_v2 = vpop.f32.mrf.mxu1 }
 0x347   :  { %v537_v5 = vpop.f32.mrf.mxu2 }
 0x348   :  { %v538_v6 = vadd.f32 %v812_v4, %v537_v5 }
 0x34a   :  { %v541_v7 = vmax.f32 %v538_v6, 0.0 }
 0x34c   :  { %v542_v8 = vpack.c.bf16 %v541_v7, %v541_v7 }
 0x34e   :  { %760 = vmatmul.msk.bf16.vlgmr.msrb.gmra.mxu3 %vm242_vm2, %v542_v8 }
 0x34f   :  { %v539_v9 = vpop.f32.mrf.mxu2 }
 0x3d1   :  { %v591_v11 = vpop.f32.mrf.mxu3 }
 0x3d2   :  { %v592_v12 = vadd.f32 %v813_v10, %v591_v11 }
 0x3d4   :  { %v595_v13 = vpack.c.bf16 %v592_v12, %v592_v12 }
 0x3d6   :  { %597 = vrot.lane.b32.xlu0 %v595_v13, %s1054_s1 }
 0x3d9   :  { %v593_v14 = vpop.f32.mrf.mxu3 }
 0x448   :  { %v598_v15 = vpop.permute.xlu0 %597 }
 0x449   :  { %601 = vst.msk [vmem:[#allocation16 + $0x4] sm:$0xf] %vm600_vm5, %v598_v15 }
 0x44a   :  { %603 = vst.msk [vmem:[#allocation16 + $0x4] sm:$0xf] %vm602_vm6, %v1056_v16 }
 0x44b   :  { %614 = dma.vmem_to_hbm [thread:$0]  %s610_s16, 128, %s612_s20, [#allocation4]  }
 0x44c   :  { %1040 = dma.done.wait [#allocation4], 128  }
 0x44d   :  { %1041 = vsyncadd [#allocation4], 4294967168 }
 0x44e   :  { %619 = vsyncpa [#allocation3], 1 }
 0x44f   :  { %620 = vsyncpa [#allocation6], 1 }
 0x450   :  { %621 = vsyncpa [#allocation9], 1 }
 0x451   :  { %622 = vsyncpa [#allocation12], 1 }
 0x452   :  { %623 = vsyncpa [#allocation15], 1 }
 0x453   :  { %624 = vsyncpa [#allocation4], 1 }

</bundles_post_ra>
